<compile_context>
chip_gen: v6e
topology: v6e:2x2x1
jax: 0.10.0
libtpu: 0.0.40
codegen_flags: <defaults>
</compile_context>

<pallas_src>
import functools

import numpy as np
import jax
import jax.numpy as jnp
from jax.experimental import pallas as pl
from jax.experimental.pallas import tpu as pltpu


def _roi_pool_kernel(batch_idx_ref, bounds_ref, order_ref, x_ref, out_ref, *,
                     pooled_h, pooled_w, height, width):
    # batch_idx_ref: SMEM int32 (R,)    -- consumed by the input index_map
    # bounds_ref:    SMEM int32 (4*R,)  -- flat [start_h, start_w, end_h, end_w]
    # order_ref:     SMEM int32 (R,)    -- consumed by the output index_map
    # x_ref:         VMEM (1, H, W, C_BLK)      channels-last image tile
    # out_ref:       VMEM (1, PH*PW, C_BLK)     lane-dense pooled output
    del batch_idx_ref, order_ref
    i = pl.program_id(1)

    start_h = bounds_ref[4 * i + 0]
    start_w = bounds_ref[4 * i + 1]
    end_h = bounds_ref[4 * i + 2]
    end_w = bounds_ref[4 * i + 3]

    roi_h = jnp.maximum(end_h - start_h + 1, 1)
    roi_w = jnp.maximum(end_w - start_w + 1, 1)
    # True division (not multiply-by-reciprocal) to match mmcv bin boundaries.
    bin_h = roi_h.astype(jnp.float32) / float(pooled_h)
    bin_w = roi_w.astype(jnp.float32) / float(pooled_w)

    c_blk = x_ref.shape[-1]
    dtype = x_ref.dtype
    if jnp.issubdtype(dtype, jnp.floating):
        neg = jnp.asarray(jnp.finfo(dtype).min, dtype=dtype)   # -FLT_MAX (mmcv)
    else:
        neg = jnp.asarray(jnp.iinfo(dtype).min, dtype=dtype)
    zero = jnp.zeros((1, c_blk), dtype=out_ref.dtype)
    band_init = jnp.full((1, width, c_blk), neg, dtype=dtype)

    w_idx = jax.lax.broadcasted_iota(jnp.int32, (width, 1), 0)   # (W, 1)

    results = []
    for ph in range(pooled_h):
        hstart = jnp.clip(jnp.floor(ph * bin_h).astype(jnp.int32) + start_h,
                          0, height)
        hend = jnp.clip(jnp.ceil((ph + 1) * bin_h).astype(jnp.int32) + start_h,
                        0, height)
        h_empty = hend <= hstart

        # Single pass over only this bin's rows (dynamic trip count):
        # band[0, w, c] = max_{h in [hstart, hend)} x[h, w, c]
        def row_body(h, band):
            return jnp.maximum(band, x_ref[0, pl.ds(h, 1)])     # (1, W, C_BLK)

        band = jax.lax.fori_loop(hstart, hend, row_body, band_init)

        for pw in range(pooled_w):
            wstart = jnp.clip(jnp.floor(pw * bin_w).astype(jnp.int32) + start_w,
                              0, width)
            wend = jnp.clip(jnp.ceil((pw + 1) * bin_w).astype(jnp.int32) + start_w,
                            0, width)
            # Recompute the (W,1) compare per pw (cheap) instead of hoisting all
            # PW masks (which spills the vreg file for realistic W, PW).
            w_mask = (w_idx >= wstart) & (w_idx < wend)
            is_empty = jnp.logical_or(h_empty, wend <= wstart)
            binmax = jnp.max(jnp.where(w_mask[None], band, neg), axis=1)  # (1, C_BLK)
            results.append(jnp.where(is_empty, zero, binmax.astype(out_ref.dtype)))

    # One dense multi-sublane store instead of PH*PW single-row masked stores.
    out_ref[0, :, :] = jnp.concatenate(results, axis=0)


def _choose_c_block(C, H, W, itemsize, max_block_bytes):
    """Return (c_blk, padded_C): lane-aligned channel tile within the VMEM budget."""
    full = C * H * W * itemsize
    if full <= max_block_bytes:
        return C, C
    # Need to tile channels: pad C up to a multiple of 128 so every tile is
    # lane-aligned (fixes the old fallback that returned an over-budget full C).
    c_pad = ((C + 127) // 128) * 128
    best = 128   # fallback; TODO(synk): H/W tiling if even 128 channels overflow
    for c in range(128, c_pad + 1, 128):
        if c_pad % c == 0 and c * H * W * itemsize <= max_block_bytes:
            best = c
    return best, c_pad


def roi_pool(x, rois, output_size, spatial_scale=1.0, channels_last=False):
    """Pallas RoIPool forward.

    x:    (N, C, H, W) by default, or (N, H, W, C) if channels_last=True.
    rois: (R, 5) = (batch_idx, x1, y1, x2, y2).
    Returns (R, C, pooled_h, pooled_w).
    """
    pooled_h, pooled_w = output_size
    assert rois.shape[1] == 5, 'RoI must be (idx, x1, y1, x2, y2).'
    R = rois.shape[0]

    if channels_last:
        x_nhwc = x
        N, H, W, C = x.shape
    else:
        N, C, H, W = x.shape
        # TODO(synk): producer-side NHWC / caching would avoid this full
        # HBM read+write transpose on every call.
        x_nhwc = jnp.transpose(x, (0, 2, 3, 1))   # (N, H, W, C)

    batch_idx = rois[:, 0].astype(jnp.int32)
    coords = rois[:, 1:5].astype(jnp.float32) * spatial_scale
    # round-half-away-from-zero, matching C round() in the CUDA kernel
    coords_i = (jnp.sign(coords) * jnp.floor(jnp.abs(coords) + 0.5)).astype(jnp.int32)
    start_w, start_h = coords_i[:, 0], coords_i[:, 1]
    end_w, end_h = coords_i[:, 2], coords_i[:, 3]

    # Sort RoIs by batch index so consecutive grid steps reuse the same image
    # block (Pallas skips the DMA when the input block index repeats).  The
    # inverse permutation is folded into the output index_map (write results
    # straight to their original rows -> no post-gather pass in XLA).
    order = jnp.argsort(batch_idx).astype(jnp.int32)
    batch_idx_s = batch_idx[order]
    bounds = jnp.stack([start_h, start_w, end_h, end_w], axis=1)[order]
    bounds_flat = bounds.reshape(-1).astype(jnp.int32)   # 1-D avoids SMEM padding

    itemsize = x.dtype.itemsize
    try:
        vmem_cap = int(pltpu.get_tpu_info().vmem_capacity_bytes)
    except Exception:                      # unknown chip / interpret fallback
        vmem_cap = 64 << 20
    # Generation-aware budgets: ~25 MiB blocks on 128 MiB VMEM parts (v5e/v6e),
    # ~12 MiB on v7x (64 MiB VMEM).
    max_block_bytes = max(vmem_cap // 5, 4 << 20)

    c_blk, c_pad = _choose_c_block(C, H, W, itemsize, max_block_bytes)
    if c_pad != C:
        x_nhwc = jnp.pad(x_nhwc, ((0, 0), (0, 0), (0, 0), (0, c_pad - C)))
    num_c = c_pad // c_blk

    in_block_bytes = H * W * c_blk * itemsize
    out_block_bytes = pooled_h * pooled_w * c_blk * itemsize
    # Double-buffered input + output plus slack; cap at 3/4 of physical VMEM
    # (<= 96 MiB on v5e/v6e, <= 48 MiB on v7x).
    vmem_limit = 2 * (in_block_bytes + out_block_bytes) + (8 << 20)
    vmem_limit = int(min(max(vmem_limit, 32 << 20), (vmem_cap * 3) // 4))

    kernel = functools.partial(_roi_pool_kernel, pooled_h=pooled_h,
                               pooled_w=pooled_w, height=H, width=W)

    out = pl.pallas_call(
        kernel,
        out_shape=jax.ShapeDtypeStruct((R, pooled_h * pooled_w, c_pad), x.dtype),
        grid_spec=pltpu.PrefetchScalarGridSpec(
            num_scalar_prefetch=3,
            grid=(num_c, R),
            in_specs=[
                pl.BlockSpec((1, H, W, c_blk),
                             lambda c, i, bidx, bnds, ordr: (bidx[i], 0, 0, c)),
            ],
            out_specs=pl.BlockSpec((1, pooled_h * pooled_w, c_blk),
                                   lambda c, i, bidx, bnds, ordr: (ordr[i], 0, c)),
        ),
        compiler_params=pltpu.CompilerParams(
            # Both axes are fully independent -> shard freely across v7x's 2 TCs.
            dimension_semantics=("parallel", "parallel"),
            vmem_limit_bytes=vmem_limit),
    )(batch_idx_s, bounds_flat, order, x_nhwc)

    if c_pad != C:
        out = out[:, :, :C]
    out = jnp.transpose(out, (0, 2, 1))        # (R, C, PH*PW)
    return out.reshape(R, C, pooled_h, pooled_w)


class RoIPool:
    """MaxRoIPool (forward only), Pallas TPU implementation."""

    def __init__(self, output_size, spatial_scale=1.0):
        if isinstance(output_size, int):
            output_size = (output_size, output_size)
        self.output_size = tuple(output_size)
        self.spatial_scale = float(spatial_scale)

    def __call__(self, x, rois):
        return roi_pool(x, rois, self.output_size, self.spatial_scale)

    def __repr__(self):
        return (f'{self.__class__.__name__}(output_size={self.output_size}, '
                f'spatial_scale={self.spatial_scale})')


def roi_pool_ref(x, rois, output_size, spatial_scale):
    """Pure-numpy reference reproducing mmcv roi_pool_forward."""
    x = np.asarray(x)
    rois = np.asarray(rois)
    PH, PW = output_size
    _, C, H, W = x.shape
    R = rois.shape[0]
    out = np.zeros((R, C, PH, PW), dtype=x.dtype)
    for r in range(R):
        b = int(rois[r, 0])
        c = rois[r, 1:5] * spatial_scale
        ci = (np.sign(c) * np.floor(np.abs(c) + 0.5)).astype(np.int32)
        sw, sh, ew, eh = int(ci[0]), int(ci[1]), int(ci[2]), int(ci[3])
        rh = max(eh - sh + 1, 1)
        rw = max(ew - sw + 1, 1)
        bh = rh / PH
        bw = rw / PW
        for ph in range(PH):
            hs = min(max(int(np.floor(ph * bh)) + sh, 0), H)
            he = min(max(int(np.ceil((ph + 1) * bh)) + sh, 0), H)
            for pw in range(PW):
                ws = min(max(int(np.floor(pw * bw)) + sw, 0), W)
                we = min(max(int(np.ceil((pw + 1) * bw)) + sw, 0), W)
                if he <= hs or we <= ws:
                    out[r, :, ph, pw] = 0
                else:
                    out[r, :, ph, pw] = x[b, :, hs:he, ws:we].max(axis=(1, 2))
    return out


if __name__ == "__main__":
    key = jax.random.PRNGKey(0)
    N, C, H, W = 2, 4, 16, 16
    x = jax.random.normal(key, (N, C, H, W), dtype=jnp.float32)

    # (batch_idx, x1, y1, x2, y2) in image coords; spatial_scale maps to features.
    # Batch indices are deliberately out of order (exercises sort + folded inverse
    # permutation), and the last RoI hangs off the feature map (empty-bin zeroing).
    rois = jnp.array([
        [0.0, 0.0, 0.0, 12.0, 12.0],
        [1.0, 4.0, 4.0, 28.0, 28.0],
        [0.0, 6.0, 2.0, 22.0, 10.0],
        [1.0, 30.0, 30.0, 40.0, 40.0],
    ], dtype=jnp.float32)

    module = RoIPool(output_size=(2, 2), spatial_scale=0.5)
    out = jax.block_until_ready(module(x, rois))

    ref = roi_pool_ref(x, rois, (2, 2), 0.5)
    assert out.shape == ref.shape == (4, C, 2, 2)
    np.testing.assert_allclose(np.asarray(out), ref, rtol=1e-6, atol=1e-6)

    print("KERNEL_OK")
</pallas_src>

<mosaic_0001>
module attributes {stable_mosaic.version = 11 : i64} {
  func.func @_roi_pool_kernel(%arg0: i32, %arg1: i32, %arg2: memref<4xi32, #tpu.memory_space<smem>>, %arg3: memref<16xi32, #tpu.memory_space<smem>>, %arg4: memref<4xi32, #tpu.memory_space<smem>>, %arg5: memref<1x16x16x4xf32, #tpu.memory_space<vmem>>, %arg6: memref<1x4x4xf32, #tpu.memory_space<vmem>>) attributes {dimension_semantics = [#tpu.dimension_semantics<parallel>, #tpu.dimension_semantics<parallel>], iteration_bounds = array<i64: 1, 4>, scalar_prefetch = 3 : i64, scratch_operands = 0 : i64, tpu.core_type = #tpu.core_type<tc>, window_params = [{transform_indices = @transform_0, window_bounds = array<i64: 1, 16, 16, 4>}, {transform_indices = @transform_1, window_bounds = array<i64: 1, 4, 4>}]} {
    %c4_i32 = arith.constant 4 : i32
    %0 = arith.muli %c4_i32, %arg1 : i32
    %c0_i32 = arith.constant 0 : i32
    %1 = arith.addi %0, %c0_i32 : i32
    %2 = arith.index_cast %1 : i32 to index
    %3 = memref.load %arg3[%2] : memref<16xi32, #tpu.memory_space<smem>>
    %c4_i32_0 = arith.constant 4 : i32
    %4 = arith.muli %c4_i32_0, %arg1 : i32
    %c1_i32 = arith.constant 1 : i32
    %5 = arith.addi %4, %c1_i32 : i32
    %6 = arith.index_cast %5 : i32 to index
    %7 = memref.load %arg3[%6] : memref<16xi32, #tpu.memory_space<smem>>
    %c4_i32_1 = arith.constant 4 : i32
    %8 = arith.muli %c4_i32_1, %arg1 : i32
    %c2_i32 = arith.constant 2 : i32
    %9 = arith.addi %8, %c2_i32 : i32
    %10 = arith.index_cast %9 : i32 to index
    %11 = memref.load %arg3[%10] : memref<16xi32, #tpu.memory_space<smem>>
    %c4_i32_2 = arith.constant 4 : i32
    %12 = arith.muli %c4_i32_2, %arg1 : i32
    %c3_i32 = arith.constant 3 : i32
    %13 = arith.addi %12, %c3_i32 : i32
    %14 = arith.index_cast %13 : i32 to index
    %15 = memref.load %arg3[%14] : memref<16xi32, #tpu.memory_space<smem>>
    %16 = arith.subi %11, %3 : i32
    %c1_i32_3 = arith.constant 1 : i32
    %17 = arith.addi %16, %c1_i32_3 : i32
    %c1_i32_4 = arith.constant 1 : i32
    %18 = arith.maxsi %17, %c1_i32_4 : i32
    %19 = arith.subi %15, %7 : i32
    %c1_i32_5 = arith.constant 1 : i32
    %20 = arith.addi %19, %c1_i32_5 : i32
    %c1_i32_6 = arith.constant 1 : i32
    %21 = arith.maxsi %20, %c1_i32_6 : i32
    %22 = arith.sitofp %18 : i32 to f32
    %cst = arith.constant 2.000000e+00 : f32
    %23 = arith.divf %22, %cst : f32
    %24 = arith.sitofp %21 : i32 to f32
    %cst_7 = arith.constant 2.000000e+00 : f32
    %25 = arith.divf %24, %cst_7 : f32
    %cst_8 = arith.constant 0.000000e+00 : f32
    %26 = vector.broadcast %cst_8 : f32 to vector<1x4xf32>
    %cst_9 = arith.constant -3.40282347E+38 : f32
    %27 = vector.broadcast %cst_9 : f32 to vector<1x16x4xf32>
    %28 = tpu.iota {dimensions = array<i32: 0>} : vector<16x1xi32>
    %cst_10 = arith.constant 0.000000e+00 : f32
    %29 = arith.mulf %cst_10, %23 : f32
    %30 = math.floor %29 : f32
    %31 = arith.fptosi %30 : f32 to i32
    %32 = arith.addi %31, %3 : i32
    %c0_i32_11 = arith.constant 0 : i32
    %c16_i32 = arith.constant 16 : i32
    %33 = arith.maxsi %c0_i32_11, %32 : i32
    %34 = arith.minsi %c16_i32, %33 : i32
    %cst_12 = arith.constant 1.000000e+00 : f32
    %35 = arith.mulf %cst_12, %23 : f32
    %36 = math.ceil %35 : f32
    %37 = arith.fptosi %36 : f32 to i32
    %38 = arith.addi %37, %3 : i32
    %c0_i32_13 = arith.constant 0 : i32
    %c16_i32_14 = arith.constant 16 : i32
    %39 = arith.maxsi %c0_i32_13, %38 : i32
    %40 = arith.minsi %c16_i32_14, %39 : i32
    %41 = arith.cmpi sle, %40, %34 : i32
    %42 = arith.subi %40, %34 : i32
    %43 = arith.addi %34, %42 : i32
    %c1_i32_15 = arith.constant 1 : i32
    %44 = scf.for %arg7 = %34 to %43 step %c1_i32_15 iter_args(%arg8 = %27) -> (vector<1x16x4xf32>)  : i32 {
      %c0_57 = arith.constant 0 : index
      %169 = arith.index_cast %arg7 : i32 to index
      %c0_58 = arith.constant 0 : index
      %c0_59 = arith.constant 0 : index
      %170 = vector.load %arg5[%c0_57, %169, %c0_58, %c0_59] : memref<1x16x16x4xf32, #tpu.memory_space<vmem>>, vector<1x1x16x4xf32>
      %171 = vector.shape_cast %170 : vector<1x1x16x4xf32> to vector<1x16x4xf32>
      %172 = arith.maximumf %arg8, %171 : vector<1x16x4xf32>
      scf.yield %172 : vector<1x16x4xf32>
    }
    %cst_16 = arith.constant 0.000000e+00 : f32
    %45 = arith.mulf %cst_16, %25 : f32
    %46 = math.floor %45 : f32
    %47 = arith.fptosi %46 : f32 to i32
    %48 = arith.addi %47, %7 : i32
    %c0_i32_17 = arith.constant 0 : i32
    %c16_i32_18 = arith.constant 16 : i32
    %49 = arith.maxsi %c0_i32_17, %48 : i32
    %50 = arith.minsi %c16_i32_18, %49 : i32
    %cst_19 = arith.constant 1.000000e+00 : f32
    %51 = arith.mulf %cst_19, %25 : f32
    %52 = math.ceil %51 : f32
    %53 = arith.fptosi %52 : f32 to i32
    %54 = arith.addi %53, %7 : i32
    %c0_i32_20 = arith.constant 0 : i32
    %c16_i32_21 = arith.constant 16 : i32
    %55 = arith.maxsi %c0_i32_20, %54 : i32
    %56 = arith.minsi %c16_i32_21, %55 : i32
    %57 = vector.broadcast %50 : i32 to vector<16x1xi32>
    %58 = arith.cmpi sge, %28, %57 : vector<16x1xi32>
    %59 = vector.broadcast %56 : i32 to vector<16x1xi32>
    %60 = arith.cmpi slt, %28, %59 : vector<16x1xi32>
    %61 = arith.andi %58, %60 : vector<16x1xi1>
    %62 = arith.cmpi sle, %56, %50 : i32
    %63 = arith.ori %41, %62 : i1
    %64 = vector.shape_cast %61 : vector<16x1xi1> to vector<1x16x1xi1>
    %cst_22 = arith.constant -3.40282347E+38 : f32
    %65 = vector.shape_cast %64 : vector<1x16x1xi1> to vector<1x16x1xi1>
    %66 = vector.broadcast %65 : vector<1x16x1xi1> to vector<1x16x4xi1>
    %67 = vector.broadcast %cst_22 : f32 to vector<1x16x4xf32>
    %68 = arith.select %66, %44, %67 : vector<1x16x4xi1>, vector<1x16x4xf32>
    %cst_23 = arith.constant dense<0xFF800000> : vector<1x4xf32>
    %69 = vector.multi_reduction <maximumf>, %68, %cst_23 [1] : vector<1x16x4xf32> to vector<1x4xf32>
    %70 = arith.select %63, %26, %69 : vector<1x4xf32>
    %cst_24 = arith.constant 1.000000e+00 : f32
    %71 = arith.mulf %cst_24, %25 : f32
    %72 = math.floor %71 : f32
    %73 = arith.fptosi %72 : f32 to i32
    %74 = arith.addi %73, %7 : i32
    %c0_i32_25 = arith.constant 0 : i32
    %c16_i32_26 = arith.constant 16 : i32
    %75 = arith.maxsi %c0_i32_25, %74 : i32
    %76 = arith.minsi %c16_i32_26, %75 : i32
    %cst_27 = arith.constant 2.000000e+00 : f32
    %77 = arith.mulf %cst_27, %25 : f32
    %78 = math.ceil %77 : f32
    %79 = arith.fptosi %78 : f32 to i32
    %80 = arith.addi %79, %7 : i32
    %c0_i32_28 = arith.constant 0 : i32
    %c16_i32_29 = arith.constant 16 : i32
    %81 = arith.maxsi %c0_i32_28, %80 : i32
    %82 = arith.minsi %c16_i32_29, %81 : i32
    %83 = vector.broadcast %76 : i32 to vector<16x1xi32>
    %84 = arith.cmpi sge, %28, %83 : vector<16x1xi32>
    %85 = vector.broadcast %82 : i32 to vector<16x1xi32>
    %86 = arith.cmpi slt, %28, %85 : vector<16x1xi32>
    %87 = arith.andi %84, %86 : vector<16x1xi1>
    %88 = arith.cmpi sle, %82, %76 : i32
    %89 = arith.ori %41, %88 : i1
    %90 = vector.shape_cast %87 : vector<16x1xi1> to vector<1x16x1xi1>
    %cst_30 = arith.constant -3.40282347E+38 : f32
    %91 = vector.shape_cast %90 : vector<1x16x1xi1> to vector<1x16x1xi1>
    %92 = vector.broadcast %91 : vector<1x16x1xi1> to vector<1x16x4xi1>
    %93 = vector.broadcast %cst_30 : f32 to vector<1x16x4xf32>
    %94 = arith.select %92, %44, %93 : vector<1x16x4xi1>, vector<1x16x4xf32>
    %cst_31 = arith.constant dense<0xFF800000> : vector<1x4xf32>
    %95 = vector.multi_reduction <maximumf>, %94, %cst_31 [1] : vector<1x16x4xf32> to vector<1x4xf32>
    %96 = arith.select %89, %26, %95 : vector<1x4xf32>
    %cst_32 = arith.constant 1.000000e+00 : f32
    %97 = arith.mulf %cst_32, %23 : f32
    %98 = math.floor %97 : f32
    %99 = arith.fptosi %98 : f32 to i32
    %100 = arith.addi %99, %3 : i32
    %c0_i32_33 = arith.constant 0 : i32
    %c16_i32_34 = arith.constant 16 : i32
    %101 = arith.maxsi %c0_i32_33, %100 : i32
    %102 = arith.minsi %c16_i32_34, %101 : i32
    %cst_35 = arith.constant 2.000000e+00 : f32
    %103 = arith.mulf %cst_35, %23 : f32
    %104 = math.ceil %103 : f32
    %105 = arith.fptosi %104 : f32 to i32
    %106 = arith.addi %105, %3 : i32
    %c0_i32_36 = arith.constant 0 : i32
    %c16_i32_37 = arith.constant 16 : i32
    %107 = arith.maxsi %c0_i32_36, %106 : i32
    %108 = arith.minsi %c16_i32_37, %107 : i32
    %109 = arith.cmpi sle, %108, %102 : i32
    %110 = arith.subi %108, %102 : i32
    %111 = arith.addi %102, %110 : i32
    %c1_i32_38 = arith.constant 1 : i32
    %112 = scf.for %arg7 = %102 to %111 step %c1_i32_38 iter_args(%arg8 = %27) -> (vector<1x16x4xf32>)  : i32 {
      %c0_57 = arith.constant 0 : index
      %169 = arith.index_cast %arg7 : i32 to index
      %c0_58 = arith.constant 0 : index
      %c0_59 = arith.constant 0 : index
      %170 = vector.load %arg5[%c0_57, %169, %c0_58, %c0_59] : memref<1x16x16x4xf32, #tpu.memory_space<vmem>>, vector<1x1x16x4xf32>
      %171 = vector.shape_cast %170 : vector<1x1x16x4xf32> to vector<1x16x4xf32>
      %172 = arith.maximumf %arg8, %171 : vector<1x16x4xf32>
      scf.yield %172 : vector<1x16x4xf32>
    }
    %cst_39 = arith.constant 0.000000e+00 : f32
    %113 = arith.mulf %cst_39, %25 : f32
    %114 = math.floor %113 : f32
    %115 = arith.fptosi %114 : f32 to i32
    %116 = arith.addi %115, %7 : i32
    %c0_i32_40 = arith.constant 0 : i32
    %c16_i32_41 = arith.constant 16 : i32
    %117 = arith.maxsi %c0_i32_40, %116 : i32
    %118 = arith.minsi %c16_i32_41, %117 : i32
    %cst_42 = arith.constant 1.000000e+00 : f32
    %119 = arith.mulf %cst_42, %25 : f32
    %120 = math.ceil %119 : f32
    %121 = arith.fptosi %120 : f32 to i32
    %122 = arith.addi %121, %7 : i32
    %c0_i32_43 = arith.constant 0 : i32
    %c16_i32_44 = arith.constant 16 : i32
    %123 = arith.maxsi %c0_i32_43, %122 : i32
    %124 = arith.minsi %c16_i32_44, %123 : i32
    %125 = vector.broadcast %118 : i32 to vector<16x1xi32>
    %126 = arith.cmpi sge, %28, %125 : vector<16x1xi32>
    %127 = vector.broadcast %124 : i32 to vector<16x1xi32>
    %128 = arith.cmpi slt, %28, %127 : vector<16x1xi32>
    %129 = arith.andi %126, %128 : vector<16x1xi1>
    %130 = arith.cmpi sle, %124, %118 : i32
    %131 = arith.ori %109, %130 : i1
    %132 = vector.shape_cast %129 : vector<16x1xi1> to vector<1x16x1xi1>
    %cst_45 = arith.constant -3.40282347E+38 : f32
    %133 = vector.shape_cast %132 : vector<1x16x1xi1> to vector<1x16x1xi1>
    %134 = vector.broadcast %133 : vector<1x16x1xi1> to vector<1x16x4xi1>
    %135 = vector.broadcast %cst_45 : f32 to vector<1x16x4xf32>
    %136 = arith.select %134, %112, %135 : vector<1x16x4xi1>, vector<1x16x4xf32>
    %cst_46 = arith.constant dense<0xFF800000> : vector<1x4xf32>
    %137 = vector.multi_reduction <maximumf>, %136, %cst_46 [1] : vector<1x16x4xf32> to vector<1x4xf32>
    %138 = arith.select %131, %26, %137 : vector<1x4xf32>
    %cst_47 = arith.constant 1.000000e+00 : f32
    %139 = arith.mulf %cst_47, %25 : f32
    %140 = math.floor %139 : f32
    %141 = arith.fptosi %140 : f32 to i32
    %142 = arith.addi %141, %7 : i32
    %c0_i32_48 = arith.constant 0 : i32
    %c16_i32_49 = arith.constant 16 : i32
    %143 = arith.maxsi %c0_i32_48, %142 : i32
    %144 = arith.minsi %c16_i32_49, %143 : i32
    %cst_50 = arith.constant 2.000000e+00 : f32
    %145 = arith.mulf %cst_50, %25 : f32
    %146 = math.ceil %145 : f32
    %147 = arith.fptosi %146 : f32 to i32
    %148 = arith.addi %147, %7 : i32
    %c0_i32_51 = arith.constant 0 : i32
    %c16_i32_52 = arith.constant 16 : i32
    %149 = arith.maxsi %c0_i32_51, %148 : i32
    %150 = arith.minsi %c16_i32_52, %149 : i32
    %151 = vector.broadcast %144 : i32 to vector<16x1xi32>
    %152 = arith.cmpi sge, %28, %151 : vector<16x1xi32>
    %153 = vector.broadcast %150 : i32 to vector<16x1xi32>
    %154 = arith.cmpi slt, %28, %153 : vector<16x1xi32>
    %155 = arith.andi %152, %154 : vector<16x1xi1>
    %156 = arith.cmpi sle, %150, %144 : i32
    %157 = arith.ori %109, %156 : i1
    %158 = vector.shape_cast %155 : vector<16x1xi1> to vector<1x16x1xi1>
    %cst_53 = arith.constant -3.40282347E+38 : f32
    %159 = vector.shape_cast %158 : vector<1x16x1xi1> to vector<1x16x1xi1>
    %160 = vector.broadcast %159 : vector<1x16x1xi1> to vector<1x16x4xi1>
    %161 = vector.broadcast %cst_53 : f32 to vector<1x16x4xf32>
    %162 = arith.select %160, %112, %161 : vector<1x16x4xi1>, vector<1x16x4xf32>
    %cst_54 = arith.constant dense<0xFF800000> : vector<1x4xf32>
    %163 = vector.multi_reduction <maximumf>, %162, %cst_54 [1] : vector<1x16x4xf32> to vector<1x4xf32>
    %164 = arith.select %157, %26, %163 : vector<1x4xf32>
    %165 = tpu.concatenate %70, %96, %138, %164 in 0 : vector<1x4xf32>, vector<1x4xf32>, vector<1x4xf32>, vector<1x4xf32> -> vector<4x4xf32>
    %c0 = arith.constant 0 : index
    %c0_55 = arith.constant 0 : index
    %c0_56 = arith.constant 0 : index
    %166 = vector.load %arg6[%c0, %c0_55, %c0_56] : memref<1x4x4xf32, #tpu.memory_space<vmem>>, vector<1x4x4xf32>
    %167 = vector.shape_cast %166 : vector<1x4x4xf32> to vector<4x4xf32>
    %168 = vector.shape_cast %165 : vector<4x4xf32> to vector<1x4x4xf32>
    tpu.vector_store %arg6[%c0, %c0_55, %c0_56], %168 {strides = array<i32>} : memref<1x4x4xf32, #tpu.memory_space<vmem>>, vector<1x4x4xf32>,
    return
  }
  func.func @transform_0(%arg0: i32, %arg1: i32, %arg2: memref<4xi32, #tpu.memory_space<smem>>, %arg3: memref<16xi32, #tpu.memory_space<smem>>, %arg4: memref<4xi32, #tpu.memory_space<smem>>) -> (i32, i32, i32, i32) {
    %0 = arith.index_cast %arg1 : i32 to index
    %1 = memref.load %arg2[%0] : memref<4xi32, #tpu.memory_space<smem>>
    %c0_i32 = arith.constant 0 : i32
    %c0_i32_0 = arith.constant 0 : i32
    %c0_i32_1 = arith.constant 0 : i32
    return %1, %c0_i32, %c0_i32_0, %arg0 : i32, i32, i32, i32
  }
  func.func @transform_1(%arg0: i32, %arg1: i32, %arg2: memref<4xi32, #tpu.memory_space<smem>>, %arg3: memref<16xi32, #tpu.memory_space<smem>>, %arg4: memref<4xi32, #tpu.memory_space<smem>>) -> (i32, i32, i32) {
    %0 = arith.index_cast %arg1 : i32 to index
    %1 = memref.load %arg4[%0] : memref<4xi32, #tpu.memory_space<smem>>
    %c0_i32 = arith.constant 0 : i32
    %c0_i32_0 = arith.constant 0 : i32
    return %1, %c0_i32, %arg0 : i32, i32, i32
  }
}

</mosaic_0001>

<bundles_post_ra>
// kernel: tpu_custom_call.1
= control target key start
LH: loop header
LB: loop body
LE: loop exit
PB: predicated region body
PF: predicated region fallthrough
CT: control target
= control target key end

     0   :  { %s1320_s0 = inlined_call_operand.vmem [shape: s32[4], index: 0, kind: input, shape index: {}]   ;;  %s1321_s3 = inlined_call_operand.vmem [shape: f32[2,16,16,4], index: 3, kind: input, shape index: {}]   ;;  %s1322_s4 = inlined_call_operand.hbm [shape: f32[4,4,4], index: 4, kind: output, shape index: {}]   ;;  %s1323_s1 = inlined_call_operand.vmem [shape: s32[16], index: 1, kind: input, shape index: {}]   ;;  %s1324_s2 = inlined_call_operand.vmem [shape: s32[4], index: 2, kind: input, shape index: {}]  }
   0x1   :  { %s9_s17 = sshll.u32 %s1320_s0, 4  ;;  %s13_s20 = sshll.u32 %s1323_s1, 4  ;;  %s10_s17 = int_to_ptr.vmem [resolvable:$true] %s9_s17  ;;  %s14_s20 = int_to_ptr.vmem [resolvable:$true] %s13_s20 }
   0x2   :  { %s727_s21 = scalar_lea.vmem %s10_s17, 16  ;;  %p732_p1 = scmp.lt.s32.totalorder %s10_s17, %s10_s17 }
   0x3   :  { %p728_p0 = scmp.ne.s32.totalorder %s10_s17, %s727_s21  ;;  %p733_p2 = scmp.lt.s32.totalorder %s727_s21, %s727_s21 }
   0x5   :  { %p734_p3 = por %p733_p2, %p732_p1 }
   0x7   :  { %p735_p4 = pnand %p734_p3, %p728_p0 }
   0x9   :  { %738 = shalt.err (!%p735_p4)  }
   0xa   :  { %s923_s22 = smov [#allocation3]   ;;  %s739_s23 = scalar_lea.vmem %s14_s20, 16 }
   0xb   :  { %12 = dma.vmem_to_smem %s10_s17, 16, %s923_s22, [#allocation2] }
   0xc   :  { %p740_p5 = scmp.ne.s32.totalorder %s14_s20, %s739_s23  ;;  %p744_p6 = scmp.lt.s32.totalorder %s14_s20, %s14_s20 }
   0xd   :  { %p745_p7 = scmp.lt.s32.totalorder %s739_s23, %s739_s23 }
   0xf   :  { %p746_p8 = por %p745_p7, %p744_p6 }
  0x11   :  { %p747_p9 = pnand %p746_p8, %p740_p5 }
  0x13   :  { %750 = shalt.err (!%p747_p9)  }
  0x14   :  { %s924_s0 = smov [#allocation4]   ;;  %s17_s25 = sshll.u32 %s1324_s2, 4  ;;  %s18_s25 = int_to_ptr.vmem [resolvable:$true] %s17_s25 }
  0x15   :  { %16 = dma.vmem_to_smem %s14_s20, 16, %s924_s0, [#allocation2] }
  0x16   :  { %s751_s26 = scalar_lea.vmem %s18_s25, 16  ;;  %p756_p11 = scmp.lt.s32.totalorder %s18_s25, %s18_s25 }
  0x17   :  { %p752_p10 = scmp.ne.s32.totalorder %s18_s25, %s751_s26  ;;  %p757_p12 = scmp.lt.s32.totalorder %s751_s26, %s751_s26 }
  0x19   :  { %p758_p13 = por %p757_p12, %p756_p11 }
  0x1b   :  { %p759_p0 = pnand %p758_p13, %p752_p10 }
  0x1d   :  { %762 = shalt.err (!%p759_p0)  }
  0x1e   :  { %s925_s27 = smov [#allocation5]  }
  0x1f   :  { %20 = dma.vmem_to_smem %s18_s25, 16, %s925_s27, [#allocation2] }
  0x20   :  { %853 = dma.done.wait [#allocation2], 48 }
  0x21   :  { %854 = vsyncadd [#allocation2], 4294967248 }
  0x22   :  { %22 = sfence }
  0x23   :  { %23 = vsyncpa [#allocation7], 0 }
  0x24   :  { %25 = vsyncpa [#allocation7 + $0x1], 0  ;;  %s961_s28 = smov 0   ;;  %s963_s29 = smov 0  }
  0x25   :  { %s965_s2 = smov 0   ;;  %s967_s30 = smov 0  }
  0x26   :  { %s969_s5 = smov 0   ;;  %s971_s6 = smov 0  }
  0x27 LB: > { %s499_s7 = sadd.s32 4294967295, %s881_s6   ;;  %s500_s8 = sadd.s32 4294967294, %s881_s6   ;;  %s881_s6 = sphi %s971_s6, %s31_s6   ;;  %s877_s5 = sphi %s969_s5, %s1354_s5   ;;  %s873_s30 = sphi %s967_s30, %s1353_s30   ;;  %s869_s2 = sphi %s965_s2, %s1352_s2   ;;  %s865_s29 = sphi %s963_s29, %s1351_s29   ;;  %s861_s28 = sphi %s961_s28, %s1350_s28  }
  0x28   : > { %s40_s9 = sadd.s32 1, %s877_s5  ;;  %s77_s10 = sld [smem:[#allocation5 + %s877_s5]] }
  0x29   : > { %p41_p1 = scmp.ge.s32.totalorder %s40_s9, 4  ;;  %p94_p2 = scmp.ne.s32.totalorder %s869_s2, %s865_s29 }
  0x2a   : > { %p95_p3 = scmp.eq.s32.totalorder %s499_s7, 3  ;;  %p100_p5 = scmp.ne.s32.totalorder %s865_s29, %s861_s28 }
  0x2b   : > { %s1356_s9 = smov (%p41_p1, %s40_s9), 0  ;;  %p101_p6 = scmp.eq.s32.totalorder %s500_s8, 3 }
  0x2c   : > { %p999_p4 = por %p95_p3, %p94_p2  ;;  %s78_s12 = sld [smem:[#allocation5 + %s1356_s9]] }
  0x2d   : > { %p503_p7 = scmp.ge.s32.totalorder %s881_s6, 1  ;;  %p132_p8 = scmp.lt.s32.totalorder %s881_s6, 5 }
  0x2e   : > { %p1008_p9 = por %p101_p6, %p100_p5  ;;  %s84_s15 = sadd.s32 1, %s869_s2 }
  0x2f   : > { %p133_p10 = pnand %p503_p7, %p132_p8 }
  0x30   : > { %s1325_s17 = sand.u32 (!%p133_p10), 1, %s865_s29   ;;  %s156_s18 = sld [smem:[#allocation3 + %s873_s30]] (!%p133_p10) }
  0x31   : > { %136 = sbr.rel (%p133_p10) target bundleno = 179 (0xb3), region = 24  ;;  %s1020_s19 = sshll.u32 (!%p133_p10), %s1325_s17, 2 }
  0x32   : > { %s79_s14 = ssub.s32 %s77_s10, %s78_s12  ;;  %s507_s20 = sshll.u32 (!%p133_p10), %s873_s30, 2 }
  0x33   : > { %p82_p11 = scmp.eq.s32.totalorder %s79_s14, 0  ;;  %s1023_s21 = sld [smem:[#allocation4 + %s507_s20]] (!%p133_p10) }
  0x34   : > { %s169_s22 = sadd.s32 (!%p133_p10), 1, %s507_s20  ;;  %s171_s23 = sadd.s32 (!%p133_p10), 2, %s507_s20 }
  0x35   : > { %s1014_s16 = scalar_select %p82_p11, %s869_s2, %s84_s15  }
  0x36   : > { %v191_v0 = vlaneseq  ;;  %s1027_s0 = sld [smem:[#allocation4 + %s169_s22]]  ;;  %s173_s1 = sadd.s32 3, %s507_s20  ;;  %v895_v3 = vmov -3.4028235e+38   ;;  %v899_v4 = vmov -3.4028235e+38  }
  0x37   : > { %s172_s24 = sld [smem:[#allocation4 + %s171_s23]]  ;;  %p157_p12 = scmp.lt.s32.totalorder %s156_s18, 1 }
  0x38   : > { %v1025_v1 = vshrl.u32 %v191_v0, 7  ;;  %s174_s25 = sld [smem:[#allocation4 + %s173_s1]] }
  0x39   : > { %s1358_s18 = smov (!%p157_p12, %s156_s18), 1 }
  0x3a   : > { %v1030_v2 = vadd.s32 8, %v1025_v1  ;;  %s554_s26 = sshll.u32 %s1358_s18, 8 }
  0x3b   : > { %s1035_s8 = scalar_lea.vmem %s1321_s3, %s554_s26 }
  0x3d   : > { %s175_s10 = ssub.s32 %s172_s24, %s1023_s21 }
  0x3e   : > { %s176_s12 = sadd.s32 1, %s175_s10  ;;  %s179_s14 = ssub.s32 %s174_s25, %s1027_s0 }
  0x3f   : > { %p177_p13 = scmp.gt.s32.totalorder %s176_s12, 1  ;;  %s180_s15 = sadd.s32 1, %s179_s14 }
  0x40   : > { %p181_p0 = scmp.gt.s32.totalorder %s180_s15, 1 }
  0x41   : > { %s1360_s12 = smov (!%p177_p13, %s176_s12), 1 }
  0x42   : > { %s1362_s15 = smov (!%p181_p0, %s180_s15), 1  ;;  %s183_s20 = scvt.s32.f32 %s1360_s12 }
  0x43   : > { %s187_s22 = scvt.s32.f32 %s1362_s15 }
  0x44   : > { %s1039_s23 = smul.f32 0.5, %s183_s20 }
  0x45   : > { %s1041_s18 = smul.f32 0.5, %s187_s22 }
  0x46   : > { %s194_s1 = smul.f32 0.0, %s1039_s23  ;;  %s202_s24 = sceil.f32 %s1039_s23 }
  0x47   : > { %s574_s26 = scvt.f32.s32 %s202_s24 }
  0x48   : > { %s195_s27 = sfloor.f32 %s194_s1 }
  0x49   : > { %s572_s25 = scvt.f32.s32 %s195_s27  ;;  %s204_s7 = sadd.s32 %s574_s26, %s1023_s21 }
  0x4a   : > { %p205_p1 = scmp.gt.s32.totalorder %s204_s7, 0  ;;  %p513_p2 = scmp.lt.s32.totalorder %s204_s7, 16 }
  0x4b   : > { %s197_s10 = sadd.s32 %s572_s25, %s1023_s21 }
  0x4c   : > { %p198_p3 = scmp.gt.s32.totalorder %s197_s10, 0  ;;  %p508_p5 = scmp.lt.s32.totalorder %s197_s10, 16 }
  0x4d   : > { %s1364_s7 = smov (!%p205_p1, %s204_s7), 0 }
  0x4e   : > { %s1366_s10 = smov (!%p198_p3, %s197_s10), 0  ;;  %s1368_s7 = smov (!%p513_p2, %s1364_s7), 16 }
  0x4f   : > { %s1370_s10 = smov (!%p508_p5, %s1366_s10), 16 }
  0x50   : > { %p209_p6 = scmp.le.s32.totalorder %s1368_s7, %s1370_s10  ;;  %p449_p7 = scmp.ge.s32.totalorder %s1370_s10, %s1368_s7 }
  0x51   : > { %s891_s14 = smov (!%p449_p7), %s1370_s10  }
  0x52   : > { %452 = sbr.rel (%p449_p7) target bundleno = 96 (0x60), region = 69 }
  0x57   : > { %v883_v5 = vmov -3.4028235e+38   ;;  %v887_v6 = vmov -3.4028235e+38  }
  0x58 LB: >> { %s518_s15 = sshll.u32 %s893_s14, 4  ;;  %s213_s14 = sadd.s32 1, %s893_s14   ;;  %s893_s14 = sphi %s891_s14, %s213_s14   ;;  %v889_v6 = vphi %v887_v6, %v888_v6   ;;  %v885_v5 = vphi %v883_v5, %v884_v5  }
  0x59   : >> { %s219_s20 = scalar_lea.vmem %s1035_s8, %s518_s15  ;;  %p212_p8 = scmp.ge.s32.totalorder %s213_s14, %s1368_s7 }
  0x5a   : >> { %v220_v7 = vld [vmem:[%s219_s20] sm:$0xff]  ;;  %v221_v8 = vld [vmem:[%s219_s20 + $0x8] sm:$0xff] }
  0x5b   : >> { %v222_v9 = vmax.f32 %v889_v6, %v220_v7   ;;  %v223_v10 = vmax.f32 %v885_v5, %v221_v8   ;;  %215 = sbr.rel (!%p212_p8) target bundleno = 88 (0x58), region = 75 }
  0x5d   : >> { %v884_v5 = vmov %v223_v10   ;;  %v888_v6 = vmov %v222_v9   ;;  %v896_v3 = vmov (%p212_p8), %v223_v10   ;;  %v900_v4 = vmov (%p212_p8), %v222_v9  }
  0x60 PF: > { %s224_s22 = smul.f32 0.0, %s1041_s18  ;;  %s232_s1 = sceil.f32 %s1041_s18  ;;  %vm255_vm4 = vcmask 31744   ;;  %v915_v49 = vmov -3.4028235e+38   ;;  %v919_v50 = vmov -3.4028235e+38   ;;  %v901_v4 = vphi %v899_v4, %v900_v4   ;;  %v897_v3 = vphi %v895_v3, %v896_v3  }
  0x61   : > { %s578_s24 = scvt.f32.s32 %s232_s1  ;;  %s269_s26 = sfloor.f32 %s1041_s18 }
  0x62   : > { %s225_s27 = sfloor.f32 %s224_s22  ;;  %s580_s25 = scvt.f32.s32 %s269_s26 }
  0x63   : > { %s576_s14 = scvt.f32.s32 %s225_s27  ;;  %s234_s15 = sadd.s32 %s578_s24, %s1027_s0 }
  0x64   : > { %p235_p10 = scmp.gt.s32.totalorder %s234_s15, 0  ;;  %p524_p11 = scmp.lt.s32.totalorder %s234_s15, 16 }
  0x65   : > { %s227_s20 = sadd.s32 %s576_s14, %s1027_s0  ;;  %s271_s17 = sadd.s32 %s580_s25, %s1027_s0 }
  0x66   : > { %p228_p12 = scmp.gt.s32.totalorder %s227_s20, 0  ;;  %p519_p13 = scmp.lt.s32.totalorder %s227_s20, 16 }
  0x67   : > { %s1372_s15 = smov (!%p235_p10, %s234_s15), 0  ;;  %p272_p0 = scmp.gt.s32.totalorder %s271_s17, 0 }
  0x68   : > { %s1374_s20 = smov (!%p228_p12, %s227_s20), 0  ;;  %s1376_s15 = smov (!%p524_p11, %s1372_s15), 16 }
  0x69   : > { %s1378_s20 = smov (!%p519_p13, %s1374_s20), 16  ;;  %v242_v11 = vstv %s1376_s15  ;;  %p529_p1 = scmp.lt.s32.totalorder %s271_s17, 16 }
  0x6a   : > { %v239_v12 = vstv %s1378_s20  ;;  %vm1076_vm0 = vcmp.lt.s32.totalorder %v1025_v1, %v242_v11  ;;  %vm1081_vm1 = vcmp.lt.s32.totalorder %v1030_v2, %v242_v11  ;;  %p247_p2 = scmp.le.s32.totalorder %s1376_s15, %s1378_s20  ;;  %s276_s22 = smul.f32 2.0, %s1041_s18 }
  0x6b   : > { %vm1089_vm2 = vcmp.ge.s32.totalorder %v1025_v1, %v239_v12  ;;  %vm1094_vm3 = vcmp.ge.s32.totalorder %v1030_v2, %v239_v12  ;;  %s273_s1 = scalar_select %p272_p0, %s271_s17, 0 }
  0x6c   : > { %vm245_vm5 = vmand %vm1089_vm2, %vm1076_vm0  ;;  %p1108_p3 = por %p247_p2, %p209_p6  ;;  %s277_s24 = sceil.f32 %s276_s22 }
  0x6d   : > { %vm246_vm6 = vmand %vm1094_vm3, %vm1081_vm1  ;;  %v253_v17 = vsel %vm245_vm5, %v901_v4, -3.4028235e+38  ;;  %s1380_s1 = smov (!%p529_p1, %s273_s1), 16  ;;  %s582_s27 = scvt.f32.s32 %s277_s24 }
  0x6e   : > { %v254_v18 = vsel %vm246_vm6, %v897_v3, -3.4028235e+38  ;;  %v256_v19 = vsel %vm255_vm4, %v253_v17, -inf  ;;  %s265_s26 = scalar_select %p1108_p3, 1, 0  ;;  %v284_v24 = vstv %s1380_s1 }
  0x6f   : > { %v257_v20 = vsel %vm255_vm4, %v254_v18, -inf  ;;  %s313_s25 = sfloor.f32 %s1039_s23  ;;  %s279_s14 = sadd.s32 %s582_s27, %s1027_s0  ;;  %vm1146_vm7 = vcmp.ge.s32.totalorder %v1025_v1, %v284_v24  ;;  %vm1152_vm8 = vcmp.ge.s32.totalorder %v1030_v2, %v284_v24 }
  0x70   : > { %v258_v21 = vmax.f32 %v256_v19, %v257_v20  ;;  %s584_s17 = scvt.f32.s32 %s313_s25  ;;  %s320_s22 = smul.f32 2.0, %s1039_s23  ;;  %v266_v28 = vstv %s265_s26 }
  0x71   : > { %p280_p5 = scmp.gt.s32.totalorder %s279_s14, 0  ;;  %p534_p7 = scmp.lt.s32.totalorder %s279_s14, 16  ;;  %vm267_vm12 = vcmp.eq.s32.totalorder %v266_v28, 1 }
  0x72   : > { %v259_v22 = vrot.slane %v258_v21, 4  ;;  %s1139_s12 = sadd.s32 %s584_s17, %s1023_s21  ;;  %s321_s18 = sceil.f32 %s320_s22 }
  0x73   : > { %s1382_s14 = smov (!%p280_p5, %s279_s14), 0  ;;  %p316_p8 = scmp.gt.s32.totalorder %s1139_s12, 0 }
  0x74   : > { %v260_v23 = vmax.f32 %v258_v21, %v259_v22  ;;  %s1384_s14 = smov (!%p534_p7, %s1382_s14), 16  ;;  %p539_p10 = scmp.lt.s32.totalorder %s1139_s12, 16 }
  0x75   : > { %s317_s0 = scalar_select %p316_p8, %s1139_s12, 0  ;;  %v287_v30 = vstv %s1384_s14 }
  0x76   : > { %v261_v25 = vrot.slane %v260_v23, 2  ;;  %s586_s23 = scvt.f32.s32 %s321_s18  ;;  %vm1159_vm9 = vcmp.lt.s32.totalorder %v1025_v1, %v287_v30  ;;  %vm1164_vm10 = vcmp.lt.s32.totalorder %v1030_v2, %v287_v30  ;;  %p292_p11 = scmp.le.s32.totalorder %s1384_s14, %s1380_s1 }
  0x77   : > { %vm290_vm11 = vmand %vm1146_vm7, %vm1159_vm9  ;;  %s1386_s0 = smov (!%p539_p10, %s317_s0), 16 }
  0x78   : > { %v262_v27 = vmax.f32 %v260_v23, %v261_v25  ;;  %s323_s24 = sadd.s32 %s586_s23, %s1023_s21  ;;  %vm291_vm13 = vmand %vm1152_vm8, %vm1164_vm10  ;;  %v298_v34 = vsel %vm290_vm11, %v901_v4, -3.4028235e+38  ;;  %p293_p0 = por %p292_p11, %p209_p6 }
  0x79   : > { %p324_p12 = scmp.gt.s32.totalorder %s323_s24, 0  ;;  %p544_p13 = scmp.lt.s32.totalorder %s323_s24, 16  ;;  %v299_v36 = vsel %vm291_vm13, %v897_v3, -3.4028235e+38  ;;  %v300_v37 = vsel %vm255_vm4, %v298_v34, -inf }
  0x7a   : > { %v263_v33 = vrot.slane %v262_v27, 1  ;;  %v301_v38 = vsel %vm255_vm4, %v299_v36, -inf  ;;  %s309_s21 = scalar_select %p293_p0, 1, 0 }
  0x7b   : > { %s1388_s24 = smov (!%p324_p12, %s323_s24), 0  ;;  %v302_v40 = vmax.f32 %v300_v37, %v301_v38 }
  0x7c   : > { %v264_v35 = vmax.f32 %v262_v27, %v263_v33  ;;  %s1390_s24 = smov (!%p544_p13, %s1388_s24), 16  ;;  %v310_v45 = vstv %s309_s21 }
  0x7d   : > { %v303_v41 = vrot.slane %v302_v40, 4  ;;  %p328_p1 = scmp.le.s32.totalorder %s1390_s24, %s1386_s0  ;;  %vm311_vm14 = vcmp.eq.s32.totalorder %v310_v45, 1  ;;  %p460_p3 = scmp.ge.s32.totalorder %s1386_s0, %s1390_s24 }
  0x7e   : > { %v1197_v39 = vsel %vm267_vm12, 0.0, %v264_v35  ;;  %s911_s7 = smov (!%p460_p3), %s1386_s0  }
  0x7f   : > { %v304_v42 = vmax.f32 %v302_v40, %v303_v41 }
  0x81   : > { %v305_v43 = vrot.slane %v304_v42, 2 }
  0x83   : > { %v306_v44 = vmax.f32 %v304_v42, %v305_v43 }
  0x85   : > { %v307_v46 = vrot.slane %v306_v44, 1  ;;  %463 = sbr.rel (%p460_p3) target bundleno = 147 (0x93), region = 80 }
  0x87   : > { %v308_v47 = vmax.f32 %v306_v44, %v307_v46 }
  0x89   : > { %v1209_v48 = vsel %vm311_vm14, 0.0, %v308_v47 }
  0x8a   : > { %v903_v51 = vmov -3.4028235e+38   ;;  %v907_v52 = vmov -3.4028235e+38  }
  0x8b LB: >> { %s549_s10 = sshll.u32 %s913_s7, 4  ;;  %s332_s7 = sadd.s32 1, %s913_s7   ;;  %s913_s7 = sphi %s911_s7, %s332_s7   ;;  %v909_v52 = vphi %v907_v52, %v908_v52   ;;  %v905_v51 = vphi %v903_v51, %v904_v51  }
  0x8c   : >> { %s338_s12 = scalar_lea.vmem %s1035_s8, %s549_s10  ;;  %p331_p6 = scmp.ge.s32.totalorder %s332_s7, %s1390_s24 }
  0x8d   : >> { %v339_v53 = vld [vmem:[%s338_s12] sm:$0xff]  ;;  %v340_v54 = vld [vmem:[%s338_s12 + $0x8] sm:$0xff] }
  0x8e   : >> { %v341_v55 = vmax.f32 %v909_v52, %v339_v53   ;;  %v342_v56 = vmax.f32 %v905_v51, %v340_v54   ;;  %334 = sbr.rel (!%p331_p6) target bundleno = 139 (0x8b), region = 86 }
  0x90   : >> { %v904_v51 = vmov %v342_v56   ;;  %v908_v52 = vmov %v341_v55   ;;  %v916_v49 = vmov (%p331_p6), %v342_v56   ;;  %v920_v50 = vmov (%p331_p6), %v341_v55  }
  0x93 PF: > { %p1222_p5 = por %p328_p1, %p247_p2  ;;  %v344_v57 = vsel %vm245_vm5, %v921_v50, -3.4028235e+38  ;;  %v345_v58 = vsel %vm246_vm6, %v917_v49, -3.4028235e+38  ;;  %v360_v59 = vsel %vm290_vm11, %v921_v50, -3.4028235e+38  ;;  %p1255_p2 = por %p328_p1, %p292_p11  ;;  %v921_v50 = vphi %v919_v50, %v920_v50   ;;  %v917_v49 = vphi %v915_v49, %v916_v49  }
  0x94   : > { %v346_v60 = vsel %vm255_vm4, %v344_v57, -inf  ;;  %v347_v61 = vsel %vm255_vm4, %v345_v58, -inf  ;;  %v361_v62 = vsel %vm291_vm13, %v917_v49, -3.4028235e+38  ;;  %v362_v63 = vsel %vm255_vm4, %v360_v59, -inf  ;;  %s1392_s30 = smov (!%p999_p4, %s873_s30), 0 }
  0x95   : > { %v348_v0 = vmax.f32 %v346_v60, %v347_v61  ;;  %v363_v1 = vsel %vm255_vm4, %v361_v62, -inf  ;;  %s355_s15 = scalar_select %p1222_p5, 1, 0  ;;  %vm375_vm15 = vcmask 1040384   ;;  %vm377_vm2 = vcmask 1041408  }
  0x96   : > { %v364_v2 = vmax.f32 %v362_v63, %v363_v1  ;;  %s587_s20 = scalar_select %p999_p4, [#allocation5], [#allocation8]  ;;  %v376_v16 = vsel %vm375_vm15, %v1197_v39, %v1209_v48  ;;  %vm379_vm3 = vcmask 1042432   ;;  %vm381_vm4 = vcmask 27648  }
  0x97   : > { %v349_v3 = vrot.slane %v348_v0, 4  ;;  %s371_s1 = scalar_select %p1255_p2, 1, 0  ;;  %v356_v10 = vstv %s355_s15 }
  0x98   : > { %v365_v4 = vrot.slane %v364_v2, 4  ;;  %s391_s27 = sld [smem:[%s587_s20 + %s1392_s30]]  ;;  %vm357_vm0 = vcmp.eq.s32.totalorder %v356_v10, 1  ;;  %s1347_s25 = scalar_lea.vmem [#allocation6], %s1020_s19 }
  0x99   : > { %v350_v5 = vmax.f32 %v348_v0, %v349_v3  ;;  %v372_v12 = vstv %s371_s1  ;;  %s399_s17 = sshll.u32 %s1347_s25, 4  ;;  %s1348_s0 = smov %s1347_s25  ;;  %s400_s17 = int_to_ptr.vmem [resolvable:$true] %s399_s17 }
  0x9a   : > { %v366_v6 = vmax.f32 %v364_v2, %v365_v4  ;;  %vm373_vm1 = vcmp.eq.s32.totalorder %v372_v12, 1  ;;  %s1349_s23 = sand.u32 1, %s865_s29   ;;  %s763_s21 = scalar_lea.vmem %s400_s17, 64 }
  0x9b   : > { %v351_v7 = vrot.slane %v350_v5, 2  ;;  %s384_s24 = scalar_lea.sflag [#allocation7], %s1349_s23  ;;  %p764_p7 = scmp.ne.s32.totalorder %s400_s17, %s763_s21 }
  0x9c   : > { %v367_v8 = vrot.slane %v366_v6, 2  ;;  %s926_s7 = smov [#allocation6]  }
  0x9d   : > { %v352_v9 = vmax.f32 %v350_v5, %v351_v7  ;;  %p765_p8 = pnand %p764_p7, %p999_p4  ;;  %s767_s10 = sshll.u32 %s926_s7, 4  ;;  %s768_s10 = int_to_ptr.vmem [resolvable:$false] %s767_s10 }
  0x9e   : > { %v368_v11 = vmax.f32 %v366_v6, %v367_v8  ;;  %s551_s30 = sshll.u32 %s391_s27, 6  ;;  %s769_s12 = scalar_lea.vmem %s768_s10, 128 }
  0x9f   : > { %v353_v13 = vrot.slane %v352_v9, 1  ;;  %s1276_s18 = scalar_lea.hbm %s1322_s4, %s551_s30  ;;  %p766_p10 = pneg %p765_p8 }
  0xa0   : > { %v369_v14 = vrot.slane %v368_v11, 1  ;;  %p770_p11 = scmp.lt.s32.totalorder %s400_s17, %s768_s10  ;;  %p771_p12 = scmp.lt.s32.totalorder %s769_s12, %s763_s21 }
  0xa1   : > { %v354_v15 = vmax.f32 %v352_v9, %v353_v13 }
  0xa2   : > { %v370_v17 = vmax.f32 %v368_v11, %v369_v14  ;;  %p772_p13 = por %p771_p12, %p770_p11 }
  0xa3   : > { %v358_v18 = vsel %vm357_vm0, 0.0, %v354_v15 }
  0xa4   : > { %v374_v19 = vsel %vm373_vm1, 0.0, %v370_v17  ;;  %v378_v20 = vsel %vm377_vm2, %v376_v16, %v358_v18  ;;  %p773_p0 = pnand %p772_p13, %p766_p10 }
  0xa5   : > { %v380_v21 = vsel %vm379_vm3, %v378_v20, %v374_v19 }
  0xa6   : > { %382 = vst.msk [vmem:[%s1348_s0] sm:$0xf] %vm381_vm4, %v380_v21 }
  0xa7   : > { %776 = shalt.err (!%p773_p0)
}
  0xa8   : > { %s777_s19 = scalar_lea.hbm %s1276_s18, 64  ;;  %s781_s15 = scalar_lea.hbm %s1322_s4, 256 }
  0xa9   : > { %p778_p1 = scmp.ne.s32.totalorder %s1276_s18, %s777_s19  ;;  %p782_p5 = scmp.lt.s32.totalorder %s1276_s18, %s1322_s4 }
  0xaa   : > { %p783_p2 = scmp.lt.s32.totalorder %s781_s15, %s777_s19 }
  0xab   : > { %p779_p3 = pnand %p778_p1, %p999_p4 }
  0xac   : > { %p784_p7 = por %p783_p2, %p782_p5 }
  0xad   : > { %p780_p6 = pneg %p779_p3 }
  0xaf   : > { %p785_p8 = pnand %p784_p7, %p780_p6 }
  0xb1   : > { %788 = shalt.err (!%p785_p8)
}
  0xb2   : > { %589 = dma.vmem_to_hbm [thread:$0]  (%p999_p4), %s400_s17, 64, %s1276_s18, %s384_s24  }
  0xb3 PF: > { %p595_p10 = scmp.ge.s32.totalorder %s881_s6, 2  ;;  %s411_s27 = sand.u32 1, %s861_s28  }
  0xb4   : > { %s412_s30 = scalar_lea.sflag [#allocation7], %s411_s27 }
  0xb5   : > { %p592_p11 = pnand %p595_p10, %p1008_p9 }
  0xb7   : > { %p593_p12 = pneg %p592_p11 }
  0xb9   : > { %856 = dma.done.wait (%p593_p12), %s412_s30, 64  }
  0xba   : > { %858 = vsyncadd (%p593_p12), %s412_s30, 4294967232  ;;  %s31_s6 = sadd.s32 1, %s881_s6   ;;  %s1350_s28 = smov %s865_s29 }
  0xbb   : > { %p28_p13 = scmp.ge.s32.totalorder %s31_s6, 6   ;;  %s1351_s29 = smov %s869_s2 }
  0xbc   : > { %s1352_s2 = smov %s1014_s16  ;;  %s1353_s30 = smov %s877_s5 }
  0xbd   : > { %s1354_s5 = smov %s1356_s9  ;;  %30 = sbr.rel (!%p28_p13) target bundleno = 39 (0x27), region = 97 }
  0xc2   :  { %417 = vsyncpa [#allocation7], 1 }
  0xc3   :  { %419 = vsyncpa [#allocation7 + $0x1], 1 }

</bundles_post_ra>
